<compile_context>
chip_gen: v7x
topology: tpu7x:2x2x1
jax: 0.10.0
libtpu: 0.0.40
codegen_flags: <defaults>
</compile_context>

<pallas_src>
import jax
import jax.numpy as jnp
from jax import lax
from jax.experimental import pallas as pl
from jax.experimental.pallas import tpu as pltpu

EPS = 1e-5
NUM_FEATURES = 128

# TODO(synk): F.batch_norm(training=True) also updates the module's
# running_mean / running_var EMA buffers; that module-state side effect does
# not affect the returned tensor and is intentionally not reproduced here.


def adain_kernel(x_ref, wb_ref, o_ref):
    """Fused per-row instance norm + style affine.

    x_ref : (TILE_R, HW) in the caller's dtype (cast to f32 in-register)
    wb_ref: (TILE_R, 2)  column 0 = weight (style[0,:128]), column 1 = bias
    o_ref : (TILE_R, HW) in the caller's dtype
    """
    x = x_ref[...].astype(jnp.float32)                    # one load, f32 math
    inv_hw = 1.0 / x.shape[-1]
    # Single reduction pass: sum and sum-of-squares together (f32 accumulation).
    s1 = jnp.sum(x, axis=-1, keepdims=True)               # (TILE_R, 1)  XLU
    s2 = jnp.sum(x * x, axis=-1, keepdims=True)           # (TILE_R, 1)  XLU
    mean = s1 * inv_hw
    var = jnp.maximum(s2 * inv_hw - mean * mean, 0.0)     # biased variance
    inv_std = lax.rsqrt(var + EPS)                        # EUP, ~free slot

    wb = wb_ref[...].astype(jnp.float32)                  # (TILE_R, 2)
    scale = wb[:, 0:1] * inv_std                          # (TILE_R, 1)
    shift = wb[:, 1:2] - mean * scale                     # (TILE_R, 1)
    # 2 VALU ops/element, no full-tile temporary, lane-dense store in input dtype.
    o_ref[...] = (x * scale + shift).astype(o_ref.dtype)


def _choose_row_tile(rows, hw, itemsize):
    """Pick a row tile (multiple of 8 sublanes that divides `rows`) so that:
      * tiny problems (<= 1 MiB total) run as a single block (per-step overhead
        and the extra small DMAs dominate at that size),
      * otherwise blocks stay <= 2 MiB and, when possible, the grid has >= 4
        steps with >= ~512 KiB blocks (>= 2 steps per v7x TensorCore so DMA,
        compute and writeback overlap),
      * very large HW falls back to the minimal 8-row block (caller adds
        Buffered(1) + an explicit vmem limit for that path)."""
    total_bytes = rows * hw * itemsize
    divisors = [t for t in range(8, rows + 1, 8) if rows % t == 0]
    if not divisors or total_bytes <= (1 << 20):
        return rows                                  # single full-extent block
    max_block, min_block = 2 << 20, 512 << 10
    fitting = [t for t in divisors if t * hw * itemsize <= max_block]
    if not fitting:
        return divisors[0]                           # 8-row large-HW fallback
    good = [t for t in fitting
            if rows // t >= 4 and t * hw * itemsize >= min_block]
    if good:
        return max(good)
    multi = [t for t in fitting if rows // t >= 2]
    return max(multi) if multi else max(fitting)


def adaptive_instance_norm(content, style, num_features=NUM_FEATURES):
    """content: (N, C, H, W),  style: (S0, >= 2*num_features)."""
    N, C, H, W = content.shape
    rows, hw = N * C, H * W
    if rows != num_features:
        raise ValueError(
            f"N*C = {rows} must equal num_features = {num_features} "
            "(required by the reference F.batch_norm call).")

    # View-only reshape; keep the caller's dtype on the HBM side (no wrapper
    # astype -> no extra HBM copy, half the read bytes for bf16 inputs).
    x2d = content.reshape(rows, hw)
    # One small (rows, 2) affine input instead of two per-step DMAs.
    wb = jnp.stack(
        [style[0, :num_features], style[0, num_features:2 * num_features]],
        axis=-1)

    itemsize = x2d.dtype.itemsize
    tile_r = _choose_row_tile(rows, hw, itemsize)
    grid = (rows // tile_r,)

    block_bytes = tile_r * hw * itemsize
    big_block = block_bytes > (8 << 20)      # large-HW fallback: single-buffer
    buffers = 1 if big_block else 2

    def _io_spec():
        if big_block:
            return pl.BlockSpec((tile_r, hw), lambda i: (i, 0),
                                pipeline_mode=pl.Buffered(1))
        return pl.BlockSpec((tile_r, hw), lambda i: (i, 0))

    cp_kwargs = dict(dimension_semantics=("parallel",))
    est_vmem = 2 * buffers * block_bytes + (2 << 20)   # in+out blocks + slack
    if est_vmem > (16 << 20):                          # beyond v5e default scope
        cp_kwargs["vmem_limit_bytes"] = int(est_vmem)

    out2d = pl.pallas_call(
        adain_kernel,
        out_shape=jax.ShapeDtypeStruct((rows, hw), x2d.dtype),
        grid=grid,
        in_specs=[
            _io_spec(),
            pl.BlockSpec((tile_r, 2), lambda i: (i, 0)),
        ],
        out_specs=_io_spec(),
        compiler_params=pltpu.CompilerParams(**cp_kwargs),
    )(x2d, wb)

    return out2d.reshape(N, C, H, W)


def _reference(content, style, num_features=NUM_FEATURES):
    """Pure-JAX mirror of the PyTorch forward (instance norm + style affine)."""
    N, C, H, W = content.shape
    x = content.reshape(1, N * C, H * W).astype(jnp.float32)
    weight = style[0, :num_features].reshape(-1).astype(jnp.float32)
    bias = style[0, num_features:2 * num_features].reshape(-1).astype(jnp.float32)
    mean = x.mean(axis=(0, 2), keepdims=True)
    var = ((x - mean) ** 2).mean(axis=(0, 2), keepdims=True)  # biased variance
    out = (x - mean) / jnp.sqrt(var + EPS)
    out = out * weight[None, :, None] + bias[None, :, None]
    return out.reshape(N, C, H, W)


if __name__ == "__main__":
    # Small shapes consistent with the module: N*C must equal num_features=128;
    # style row 0 carries 128 scales followed by 128 shifts.
    N, C, H, W = 2, 64, 16, 16

    key = jax.random.PRNGKey(0)
    kc, ks = jax.random.split(key)
    content = jax.random.normal(kc, (N, C, H, W), jnp.float32)
    style = jax.random.normal(ks, (N, 2 * NUM_FEATURES), jnp.float32)

    out = adaptive_instance_norm(content, style)
    out = jax.block_until_ready(out)

    ref = _reference(content, style)
    assert out.shape == (N, C, H, W)
    assert out.dtype == content.dtype
    assert jnp.allclose(out, ref, atol=1e-4, rtol=1e-4), "mismatch vs reference"

    print("KERNEL_OK")
</pallas_src>

<mosaic_0001>
module attributes {stable_mosaic.version = 11 : i64} {
  func.func @adain_kernel(%arg0: i32, %arg1: memref<128x256xf32, #tpu.memory_space<vmem>>, %arg2: memref<128x2xf32, #tpu.memory_space<vmem>>, %arg3: memref<128x256xf32, #tpu.memory_space<vmem>>) attributes {dimension_semantics = [#tpu.dimension_semantics<parallel>], iteration_bounds = array<i64: 1>, scalar_prefetch = 0 : i64, scratch_operands = 0 : i64, tpu.core_type = #tpu.core_type<tc>, window_params = [{transform_indices = @transform_0, window_bounds = array<i64: 128, 256>}, {transform_indices = @transform_1, window_bounds = array<i64: 128, 2>}, {transform_indices = @transform_2, window_bounds = array<i64: 128, 256>}]} {
    %c0 = arith.constant 0 : index
    %c0_0 = arith.constant 0 : index
    %0 = vector.load %arg1[%c0, %c0_0] : memref<128x256xf32, #tpu.memory_space<vmem>>, vector<128x256xf32>
    %cst = arith.constant dense<0.000000e+00> : vector<128xf32>
    %1 = vector.multi_reduction <add>, %0, %cst [1] : vector<128x256xf32> to vector<128xf32>
    %2 = vector.shape_cast %1 : vector<128xf32> to vector<128x1xf32>
    %3 = arith.mulf %0, %0 : vector<128x256xf32>
    %cst_1 = arith.constant dense<0.000000e+00> : vector<128xf32>
    %4 = vector.multi_reduction <add>, %3, %cst_1 [1] : vector<128x256xf32> to vector<128xf32>
    %5 = vector.shape_cast %4 : vector<128xf32> to vector<128x1xf32>
    %cst_2 = arith.constant 3.906250e-03 : f32
    %6 = vector.broadcast %cst_2 : f32 to vector<128x1xf32>
    %7 = arith.mulf %2, %6 : vector<128x1xf32>
    %cst_3 = arith.constant 3.906250e-03 : f32
    %8 = vector.broadcast %cst_3 : f32 to vector<128x1xf32>
    %9 = arith.mulf %5, %8 : vector<128x1xf32>
    %10 = arith.mulf %7, %7 : vector<128x1xf32>
    %11 = arith.subf %9, %10 : vector<128x1xf32>
    %cst_4 = arith.constant 0.000000e+00 : f32
    %12 = vector.broadcast %cst_4 : f32 to vector<128x1xf32>
    %13 = arith.maximumf %11, %12 : vector<128x1xf32>
    %cst_5 = arith.constant 9.99999974E-6 : f32
    %14 = vector.broadcast %cst_5 : f32 to vector<128x1xf32>
    %15 = arith.addf %13, %14 : vector<128x1xf32>
    %16 = math.rsqrt %15 : vector<128x1xf32>
    %c0_6 = arith.constant 0 : index
    %c0_7 = arith.constant 0 : index
    %17 = vector.load %arg2[%c0_6, %c0_7] : memref<128x2xf32, #tpu.memory_space<vmem>>, vector<128x2xf32>
    %18 = vector.extract_strided_slice %17 {offsets = [0, 0], sizes = [128, 1], strides = [1, 1]} : vector<128x2xf32> to vector<128x1xf32>
    %19 = arith.mulf %18, %16 : vector<128x1xf32>
    %20 = vector.extract_strided_slice %17 {offsets = [0, 1], sizes = [128, 1], strides = [1, 1]} : vector<128x2xf32> to vector<128x1xf32>
    %21 = arith.mulf %7, %19 : vector<128x1xf32>
    %22 = arith.subf %20, %21 : vector<128x1xf32>
    %23 = vector.broadcast %19 : vector<128x1xf32> to vector<128x256xf32>
    %24 = arith.mulf %0, %23 : vector<128x256xf32>
    %25 = vector.broadcast %22 : vector<128x1xf32> to vector<128x256xf32>
    %26 = arith.addf %24, %25 : vector<128x256xf32>
    %c0_8 = arith.constant 0 : index
    %c0_9 = arith.constant 0 : index
    %27 = vector.load %arg3[%c0_8, %c0_9] : memref<128x256xf32, #tpu.memory_space<vmem>>, vector<128x256xf32>
    tpu.vector_store %arg3[%c0_8, %c0_9], %26 {strides = array<i32>} : memref<128x256xf32, #tpu.memory_space<vmem>>, vector<128x256xf32>,
    return
  }
  func.func @transform_0(%arg0: i32) -> (i32, i32) {
    %c0_i32 = arith.constant 0 : i32
    %c0_i32_0 = arith.constant 0 : i32
    return %arg0, %c0_i32 : i32, i32
  }
  func.func @transform_1(%arg0: i32) -> (i32, i32) {
    %c0_i32 = arith.constant 0 : i32
    %c0_i32_0 = arith.constant 0 : i32
    return %arg0, %c0_i32 : i32, i32
  }
  func.func @transform_2(%arg0: i32) -> (i32, i32) {
    %c0_i32 = arith.constant 0 : i32
    %c0_i32_0 = arith.constant 0 : i32
    return %arg0, %c0_i32 : i32, i32
  }
}

</mosaic_0001>

<bundles_post_ra>
// kernel: tpu_custom_call.1
= control target key start
LH: loop header
LB: loop body
LE: loop exit
PB: predicated region body
PF: predicated region fallthrough
CT: control target
= control target key end

     0   :  { %7 = vsyncpa [#allocation3], 0  ;;  %s1304_s0 = inlined_call_operand.hbm [shape: f32[128,256], index: 0, kind: input, shape index: {}]   ;;  %s1305_s1 = inlined_call_operand.vmem [shape: f32[128,2], index: 1, kind: input, shape index: {}]   ;;  %s1306_s2 = inlined_call_operand.hbm [shape: f32[128,256], index: 2, kind: output, shape index: {}]  }
   0x1   :  { %8 = vsyncpa [#allocation4], 0  ;;  %s790_s9 = smov [#allocation2]   ;;  %s742_s13 = scalar_lea.hbm %s1304_s0, 4096 }
   0x2   :  { %s14_s10 = sshll.u32 %s790_s9, 4  ;;  %p743_p0 = scmp.ne.s32.totalorder %s1304_s0, %s742_s13  ;;  %s15_s10 = int_to_ptr.vmem [resolvable:$true] %s14_s10 }
   0x3   :  { %p746_p1 = scmp.lt.u32.totalorder %s742_s13, %s1304_s0 }
   0x5   :  { %p748_p2 = pnand %p746_p1, %p743_p0 }
   0x7   :  { %751 = shalt.err (!%p748_p2)
}
   0x8   :  { %s752_s18 = scalar_lea.vmem %s15_s10, 4096  ;;  %p757_p4 = scmp.lt.s32.totalorder %s15_s10, %s15_s10 }
   0x9   :  { %p753_p3 = scmp.ne.s32.totalorder %s15_s10, %s752_s18  ;;  %p758_p5 = scmp.lt.s32.totalorder %s752_s18, %s752_s18 }
   0xb   :  { %p759_p6 = por %p758_p5, %p757_p4 }
   0xd   :  { %p760_p7 = pnand %p759_p6, %p753_p3 }
   0xf   :  { %763 = shalt.err (!%p760_p7)
}
  0x10   :  { %s791_s19 = smov 256   ;;  %s792_s20 = smov 16  }
  0x11   :  { %20 = dma.hbm_to_vmem [thread:$0]  %s1304_s0, 4096, %s15_s10, [#allocation3], %s791_s19, %s791_s19, %s792_s20  }
  0x12   :  { %786 = dma.done.wait [#allocation3], 4096  }
  0x13   :  { %787 = vsyncadd [#allocation3], 4294963200  ;;  %v827_v0 = vld [vmem:[#allocation2 + $0x20] sm:$0xff]  ;;  %v829_v1 = vld [vmem:[#allocation2 + $0x28] sm:$0xff]  ;;  %s794_s30 = smov 1  }
  0x14   :  { %v831_v2 = vld [vmem:[#allocation2] sm:$0xff]  ;;  %v64_v3 = vadd.f32 %v829_v1, %v827_v0  ;;  %v835_v4 = vld [vmem:[#allocation2 + $0x8] sm:$0xff]  ;;  %v837_v5 = vld [vmem:[#allocation2 + $0x30] sm:$0xff]  ;;  %v110_v56 = vmul.f32 %v827_v0, %v827_v0  ;;  %v111_v57 = vmul.f32 %v829_v1, %v829_v1 }
  0x15   :  { %v839_v6 = vld [vmem:[#allocation2 + $0x38] sm:$0xff]  ;;  %v58_v7 = vadd.f32 %v835_v4, %v831_v2  ;;  %v843_v8 = vld [vmem:[#allocation2 + $0x10] sm:$0xff]  ;;  %v855_v14 = vld [vmem:[#allocation2 + $0x40] sm:$0xff]  ;;  %v106_v50 = vmul.f32 %v831_v2, %v831_v2  ;;  %v107_v51 = vmul.f32 %v835_v4, %v835_v4  ;;  %v112_v53 = vmul.f32 %v837_v5, %v837_v5 }
  0x16   :  { %v845_v9 = vld [vmem:[#allocation2 + $0x18] sm:$0xff]  ;;  %65 = vadd.xlane.f32.xlu1 %v64_v3  ;;  %v67_v10 = vadd.f32 %v839_v6, %v837_v5  ;;  %v851_v12 = vld [vmem:[#allocation2 + $0x50] sm:$0xff]  ;;  %v857_v15 = vld [vmem:[#allocation2 + $0x48] sm:$0xff]  ;;  %v108_v47 = vmul.f32 %v843_v8, %v843_v8  ;;  %v113_v54 = vmul.f32 %v839_v6, %v839_v6  ;;  %v144_v61 = vadd.f32 %v111_v57, %v110_v56 }
  0x17   :  { %59 = vadd.xlane.f32.xlu0 %v58_v7  ;;  %v61_v11 = vadd.f32 %v845_v9, %v843_v8  ;;  %v853_v13 = vld [vmem:[#allocation2 + $0x58] sm:$0xff]  ;;  %v70_v17 = vadd.f32 %v857_v15, %v855_v14  ;;  %v863_v18 = vld [vmem:[#allocation2 + $0x70] sm:$0xff]  ;;  %v867_v20 = vld [vmem:[#allocation2 + $0x60] sm:$0xff]  ;;  %v109_v48 = vmul.f32 %v845_v9, %v845_v9  ;;  %v138_v55 = vadd.f32 %v107_v51, %v106_v50 }
  0x18   :  { %v73_v16 = vadd.f32 %v853_v13, %v851_v12  ;;  %v865_v19 = vld [vmem:[#allocation2 + $0x78] sm:$0xff]  ;;  %v869_v21 = vld [vmem:[#allocation2 + $0x68] sm:$0xff]  ;;  %v875_v24 = vld [vmem:[#allocation2 + $0x90] sm:$0xff]  ;;  %v147_v58 = vadd.f32 %v113_v54, %v112_v53  ;;  %v116_v59 = vmul.f32 %v851_v12, %v851_v12  ;;  %v117_v60 = vmul.f32 %v853_v13, %v853_v13 }
  0x19   :  { %v79_v22 = vadd.f32 %v865_v19, %v863_v18  ;;  %v76_v23 = vadd.f32 %v869_v21, %v867_v20  ;;  %1319 = vst [vmem:[#allocation8_spill] sm:$0xff] %v875_v24  ;;  %v877_v25 = vld [vmem:[#allocation2 + $0x98] sm:$0xff]  ;;  %v879_v26 = vld [vmem:[#allocation2 + $0x80] sm:$0xff]  ;;  %v881_v27 = vld [vmem:[#allocation2 + $0x88] sm:$0xff]  ;;  %v141_v52 = vadd.f32 %v109_v48, %v108_v47  ;;  %v114_v62 = vmul.f32 %v855_v14, %v855_v14 }
  0x1a   :  { %68 = vadd.xlane.f32.xlu1 %v67_v10  ;;  %1320 = vst [vmem:[#allocation9_spill] sm:$0xff] %v877_v25  ;;  %v85_v28 = vadd.f32 %v877_v25, %v875_v24  ;;  %v82_v29 = vadd.f32 %v881_v27, %v879_v26  ;;  %v887_v30 = vld [vmem:[#allocation2 + $0xb0] sm:$0xff]  ;;  %v889_v31 = vld [vmem:[#allocation2 + $0xb8] sm:$0xff]  ;;  %v891_v32 = vld [vmem:[#allocation2 + $0xa0] sm:$0xff]  ;;  %v115_v63 = vmul.f32 %v857_v15, %v857_v15 }
  0x1b   :  { %62 = vadd.xlane.f32.xlu0 %v61_v11  ;;  %1321 = vst [vmem:[#allocation10_spill] sm:$0xff] %v887_v30  ;;  %1322 = vst [vmem:[#allocation11_spill] sm:$0xff] %v889_v31  ;;  %v893_v33 = vld [vmem:[#allocation2 + $0xa8] sm:$0xff]  ;;  %v91_v34 = vadd.f32 %v889_v31, %v887_v30  ;;  %v899_v36 = vld [vmem:[#allocation2 + $0xd0] sm:$0xff]  ;;  %v153_v3 = vadd.f32 %v117_v60, %v116_v59  ;;  %v120_v7 = vmul.f32 %v863_v18, %v863_v18 }
  0x1c   :  { %v88_v35 = vadd.f32 %v893_v33, %v891_v32  ;;  %1323 = vst [vmem:[#allocation12_spill] sm:$0xff] %v899_v36  ;;  %v901_v37 = vld [vmem:[#allocation2 + $0xd8] sm:$0xff]  ;;  %v903_v38 = vld [vmem:[#allocation2 + $0xc0] sm:$0xff]  ;;  %v905_v39 = vld [vmem:[#allocation2 + $0xc8] sm:$0xff]  ;;  %v121_v10 = vmul.f32 %v865_v19, %v865_v19  ;;  %v150_v11 = vadd.f32 %v115_v63, %v114_v62  ;;  %v126_v48 = vmul.f32 %v891_v32, %v891_v32 }
  0x1d   :  { %1324 = vst [vmem:[#allocation13_spill] sm:$0xff] %v901_v37  ;;  %1325 = vst [vmem:[#allocation14_spill] sm:$0xff] %v903_v38  ;;  %v97_v40 = vadd.f32 %v901_v37, %v899_v36  ;;  %v94_v41 = vadd.f32 %v905_v39, %v903_v38  ;;  %v911_v42 = vld [vmem:[#allocation2 + $0xf0] sm:$0xff]  ;;  %v913_v43 = vld [vmem:[#allocation2 + $0xf8] sm:$0xff]  ;;  %v132_v51 = vmul.f32 %v899_v36, %v899_v36 }
  0x1e   :  { %74 = vadd.xlane.f32.xlu1 %v73_v16  ;;  %1326 = vst [vmem:[#allocation15_spill] sm:$0xff] %v905_v39  ;;  %1327 = vst [vmem:[#allocation16_spill] sm:$0xff] %v911_v42  ;;  %v915_v44 = vld [vmem:[#allocation2 + $0xe0] sm:$0xff]  ;;  %v917_v45 = vld [vmem:[#allocation2 + $0xe8] sm:$0xff]  ;;  %v103_v46 = vadd.f32 %v913_v43, %v911_v42  ;;  %v118_v16 = vmul.f32 %v867_v20, %v867_v20  ;;  %v130_v54 = vmul.f32 %v903_v38, %v903_v38 }
  0x1f   :  { %71 = vadd.xlane.f32.xlu0 %v70_v17  ;;  %1328 = vst [vmem:[#allocation17_spill] sm:$0xff] %v913_v43  ;;  %1329 = vst [vmem:[#allocation18_spill] sm:$0xff] %v915_v44  ;;  %v100_v49 = vadd.f32 %v917_v45, %v915_v44  ;;  %v119_v17 = vmul.f32 %v869_v21, %v869_v21  ;;  %v136_v57 = vmul.f32 %v911_v42, %v911_v42 }
  0x20   :  { %1330 = vst [vmem:[#allocation19_spill] sm:$0xff] %v917_v45  ;;  %v134_v60 = vmul.f32 %v915_v44, %v915_v44 }
  0x22   :  { %80 = vadd.xlane.f32.xlu1 %v79_v22  ;;  %v159_v22 = vadd.f32 %v121_v10, %v120_v7 }
  0x23   :  { %77 = vadd.xlane.f32.xlu0 %v76_v23  ;;  %v124_v23 = vmul.f32 %v875_v24, %v875_v24 }
  0x26   :  { %86 = vadd.xlane.f32.xlu1 %v85_v28  ;;  %v125_v28 = vmul.f32 %v877_v25, %v877_v25 }
  0x27   :  { %83 = vadd.xlane.f32.xlu0 %v82_v29  ;;  %v156_v29 = vadd.f32 %v119_v17, %v118_v16 }
  0x2a   :  { %92 = vadd.xlane.f32.xlu1 %v91_v34  ;;  %v122_v34 = vmul.f32 %v879_v26, %v879_v26 }
  0x2b   :  { %89 = vadd.xlane.f32.xlu0 %v88_v35  ;;  %v123_v35 = vmul.f32 %v881_v27, %v881_v27 }
  0x2d   :  { %v162_v47 = vadd.f32 %v123_v35, %v122_v34 }
  0x2e   :  { %98 = vadd.xlane.f32.xlu1 %v97_v40  ;;  %v165_v40 = vadd.f32 %v125_v28, %v124_v23 }
  0x2f   :  { %95 = vadd.xlane.f32.xlu0 %v94_v41  ;;  %v128_v41 = vmul.f32 %v887_v30, %v887_v30 }
  0x32   :  { %104 = vadd.xlane.f32.xlu1 %v103_v46  ;;  %v129_v46 = vmul.f32 %v889_v31, %v889_v31 }
  0x33   :  { %101 = vadd.xlane.f32.xlu0 %v100_v49  ;;  %v127_v49 = vmul.f32 %v893_v33, %v893_v33 }
  0x34   :  { %v171_v50 = vadd.f32 %v129_v46, %v128_v41 }
  0x35   :  { %v168_v53 = vadd.f32 %v127_v49, %v126_v48 }
  0x36   :  { %142 = vadd.xlane.f32.xlu1 %v141_v52  ;;  %v133_v52 = vmul.f32 %v901_v37, %v901_v37 }
  0x37   :  { %139 = vadd.xlane.f32.xlu0 %v138_v55  ;;  %v131_v55 = vmul.f32 %v905_v39, %v905_v39 }
  0x38   :  { %v177_v56 = vadd.f32 %v133_v52, %v132_v51 }
  0x39   :  { %v174_v59 = vadd.f32 %v131_v55, %v130_v54 }
  0x3a   :  { %148 = vadd.xlane.f32.xlu1 %v147_v58  ;;  %v137_v58 = vmul.f32 %v913_v43, %v913_v43 }
  0x3b   :  { %145 = vadd.xlane.f32.xlu0 %v144_v61  ;;  %v135_v61 = vmul.f32 %v917_v45, %v917_v45 }
  0x3c   :  { %v183_v62 = vadd.f32 %v137_v58, %v136_v57 }
  0x3d   :  { %v180_v63 = vadd.f32 %v135_v61, %v134_v60 }
  0x3e   :  { %154 = vadd.xlane.f32.xlu1 %v153_v3  ;;  %v793_v3 = vmov 0  }
  0x3f   :  { %151 = vadd.xlane.f32.xlu0 %v150_v11  ;;  %707 = vset.pattern.permute.xlu1 %v793_v3 }
  0x40   :  { %706 = vset.pattern.permute.xlu0 %v793_v3 }
  0x42   :  { %160 = vadd.xlane.f32.xlu1 %v159_v22 }
  0x43   :  { %157 = vadd.xlane.f32.xlu0 %v156_v29 }
  0x46   :  { %166 = vadd.xlane.f32.xlu1 %v165_v40 }
  0x47   :  { %163 = vadd.xlane.f32.xlu0 %v162_v47 }
  0x4a   :  { %172 = vadd.xlane.f32.xlu1 %v171_v50 }
  0x4b   :  { %169 = vadd.xlane.f32.xlu0 %v168_v53 }
  0x4e   :  { %178 = vadd.xlane.f32.xlu1 %v177_v56 }
  0x4f   :  { %175 = vadd.xlane.f32.xlu0 %v174_v59 }
  0x52   :  { %184 = vadd.xlane.f32.xlu1 %v183_v62 }
  0x53   :  { %181 = vadd.xlane.f32.xlu0 %v180_v63 }
  0xa3   :  { %v66_v7 = vpop.xlane.xlu1 %65 }
  0xa4   :  { %v60_v10 = vpop.xlane.xlu0 %59  ;;  %v1007_v56 = vmul.f32 0.00390625, %v66_v7 }
  0xa5   :  { %v1001_v50 = vmul.f32 0.00390625, %v60_v10 }
  0xa6   :  { %v220_v7 = vmul.f32 %v1007_v56, %v1007_v56 }
  0xa7   :  { %v69_v11 = vpop.xlane.xlu1 %68  ;;  %v218_v57 = vmul.f32 %v1001_v50, %v1001_v50 }
  0xa8   :  { %v63_v16 = vpop.xlane.xlu0 %62  ;;  %v1003_v52 = vmul.f32 0.00390625, %v69_v11 }
  0xa9   :  { %v997_v48 = vmul.f32 0.00390625, %v63_v16 }
  0xaa   :  { %v221_v63 = vmul.f32 %v1003_v52, %v1003_v52 }
  0xab   :  { %v75_v17 = vpop.xlane.xlu1 %74  ;;  %v219_v53 = vmul.f32 %v997_v48, %v997_v48 }
  0xac   :  { %v72_v22 = vpop.xlane.xlu0 %71  ;;  %v1011_v60 = vmul.f32 0.00390625, %v75_v17 }
  0xad   :  { %v1015_v3 = vmul.f32 0.00390625, %v72_v22 }
  0xae   :  { %v223_v17 = vmul.f32 %v1011_v60, %v1011_v60 }
  0xaf   :  { %v81_v23 = vpop.xlane.xlu1 %80  ;;  %v222_v22 = vmul.f32 %v1015_v3, %v1015_v3 }
  0xb0   :  { %v78_v28 = vpop.xlane.xlu0 %77 }
  0xb1   :  { %v1025_v37 = vmul.f32 0.00390625, %v78_v28 }
  0xb3   :  { %v87_v29 = vpop.xlane.xlu1 %86  ;;  %v224_v28 = vmul.f32 %v1025_v37, %v1025_v37 }
  0xb4   :  { %v84_v34 = vpop.xlane.xlu0 %83 }
  0xb7   :  { %v987_v35 = vpop.xlane.xlu1 %92 }
  0xb8   :  { %v989_v40 = vpop.xlane.xlu0 %89 }
  0xbb   :  { %v991_v41 = vpop.xlane.xlu1 %98 }
  0xbc   :  { %v993_v46 = vpop.xlane.xlu0 %95 }
  0xbf   :  { %v995_v47 = vpop.xlane.xlu1 %104 }
  0xc0   :  { %v999_v49 = vpop.xlane.xlu0 %101 }
  0xc1   :  { %v1082_v24 = vmul.f32 0.00390625, %v999_v49 }
  0xc3   :  { %v143_v51 = vpop.xlane.xlu1 %142 }
  0xc4   :  { %v203_v54 = vmul.f32 0.00390625, %v143_v51  ;;  %v140_v55 = vpop.xlane.xlu0 %139 }
  0xc5   :  { %v202_v58 = vmul.f32 0.00390625, %v140_v55 }
  0xc6   :  { %v235_v59 = vsub.f32 %v203_v54, %v219_v53 }
  0xc7   :  { %v234_v61 = vsub.f32 %v202_v58, %v218_v57  ;;  %v149_v62 = vpop.xlane.xlu1 %148  ;;  %v1023_v58 = vmul.f32 0.00390625, %v81_v23  ;;  %v1031_v23 = vmul.f32 0.00390625, %v84_v34 }
  0xc8   :  { %v251_v10 = vmax.f32 %v235_v59, 0.0  ;;  %v205_v11 = vmul.f32 0.00390625, %v149_v62  ;;  %v146_v16 = vpop.xlane.xlu0 %145 }
  0xc9   :  { %v250_v51 = vmax.f32 %v234_v61, 0.0  ;;  %v204_v43 = vmul.f32 0.00390625, %v146_v16  ;;  %v1027_v16 = vmul.f32 0.00390625, %v87_v29  ;;  %v225_v36 = vmul.f32 %v1023_v58, %v1023_v58 }
  0xca   :  { %v267_v42 = vadd.f32 1e-05, %v251_v10  ;;  %v237_v55 = vsub.f32 %v205_v11, %v221_v63  ;;  %v226_v34 = vmul.f32 %v1031_v23, %v1031_v23 }
  0xcb   :  { %v266_v53 = vadd.f32 1e-05, %v250_v51  ;;  %v236_v54 = vsub.f32 %v204_v43, %v220_v7  ;;  %v155_v57 = vpop.xlane.xlu1 %154  ;;  %v227_v29 = vmul.f32 %v1027_v16, %v1027_v16 }
  0xcc   :  { %710 = vrsqrt.f32 %v267_v42  ;;  %v207_v59 = vmul.f32 0.00390625, %v155_v57  ;;  %v152_v62 = vpop.xlane.xlu0 %151  ;;  %v253_v63 = vmax.f32 %v237_v55, 0.0 }
  0xcd   :  { %712 = vrsqrt.f32 %v266_v53  ;;  %v252_v61 = vmax.f32 %v236_v54, 0.0  ;;  %v206_v10 = vmul.f32 0.00390625, %v152_v62 }
  0xce   :  { %v239_v11 = vsub.f32 %v207_v59, %v223_v17  ;;  %v269_v55 = vadd.f32 1e-05, %v253_v63  ;;  %v1048_v63 = vld [vmem:[%s1305_s1 + $0x8] sm:$0xff] }
  0xcf   :  { %v268_v51 = vadd.f32 1e-05, %v252_v61  ;;  %v238_v43 = vsub.f32 %v206_v10, %v222_v22  ;;  %v161_v7 = vpop.xlane.xlu1 %160  ;;  %v1040_v10 = vmul.f32 0.00390625, %v987_v35  ;;  %v1056_v35 = vld [vmem:[%s1305_s1] sm:$0xff] }
  0xd0   :  { %v209_v42 = vmul.f32 0.00390625, %v161_v7  ;;  %v158_v57 = vpop.xlane.xlu0 %157  ;;  %v255_v17 = vmax.f32 %v239_v11, 0.0  ;;  %v1043_v7 = vmul.f32 0.00390625, %v989_v40 }
  0xd1   :  { %714 = vrsqrt.f32 %v268_v51  ;;  %v254_v53 = vmax.f32 %v238_v43, 0.0  ;;  %v208_v54 = vmul.f32 0.00390625, %v158_v57  ;;  %v1059_v57 = vmul.f32 0.00390625, %v993_v46 }
  0xd2   :  { %v241_v59 = vsub.f32 %v209_v42, %v225_v36  ;;  %v1051_v36 = vmul.f32 0.00390625, %v991_v41  ;;  %v228_v46 = vmul.f32 %v1043_v7, %v1043_v7 }
  0xd3   :  { %v270_v22 = vadd.f32 1e-05, %v254_v53  ;;  %v240_v62 = vsub.f32 %v208_v54, %v224_v28  ;;  %v167_v61 = vpop.xlane.xlu1 %166  ;;  %v271_v28 = vadd.f32 1e-05, %v255_v17 }
  0xd4   :  { %v211_v51 = vmul.f32 0.00390625, %v167_v61  ;;  %v164_v43 = vpop.xlane.xlu0 %163  ;;  %v257_v61 = vmax.f32 %v241_v59, 0.0  ;;  %v231_v59 = vmul.f32 %v1051_v36, %v1051_v36 }
  0xd5   :  { %716 = vrsqrt.f32 %v270_v22  ;;  %v256_v11 = vmax.f32 %v240_v62, 0.0  ;;  %v210_v42 = vmul.f32 0.00390625, %v164_v43  ;;  %v229_v62 = vmul.f32 %v1040_v10, %v1040_v10 }
  0xd6   :  { %v711_v40 = vpop.eup %710  ;;  %718 = vrsqrt.f32 %v269_v55  ;;  %v243_v53 = vsub.f32 %v211_v51, %v227_v29  ;;  %v1070_v29 = vld [vmem:[%s1305_s1 + $0x10] sm:$0xff] }
  0xd7   :  { %v713_v54 = vpop.eup %712  ;;  %v272_v45 = vadd.f32 1e-05, %v256_v11  ;;  %v242_v41 = vsub.f32 %v210_v42, %v226_v34  ;;  %v173_v44 = vpop.xlane.xlu1 %172  ;;  %v315_v22 = vmul.f32 %v711_v40, %v1048_v63 }
  0xd8   :  { %v213_v43 = vmul.f32 0.00390625, %v173_v44  ;;  %v170_v31 = vpop.xlane.xlu0 %169  ;;  %v314_v30 = vmul.f32 %v713_v54, %v1056_v35  ;;  %v230_v44 = vmul.f32 %v1059_v57, %v1059_v57  ;;  %v259_v34 = vmax.f32 %v243_v53, 0.0 }
  0xd9   :  { %720 = vrsqrt.f32 %v272_v45  ;;  %v258_v55 = vmax.f32 %v242_v41, 0.0  ;;  %v212_v17 = vmul.f32 0.00390625, %v170_v31  ;;  %433 = vperm.xlu1 %707, %v315_v22   ;;  %v273_v45 = vadd.f32 1e-05, %v257_v61 }
  0xda   :  { %v245_v51 = vsub.f32 %v213_v43, %v229_v62  ;;  %428 = vperm.xlu0 %706, %v314_v30   ;;  %722 = vrsqrt.f32 %v271_v28  ;;  %v1077_v54 = vmul.f32 0.00390625, %v995_v47  ;;  %v330_v38 = vmul.f32 %v314_v30, %v1001_v50  ;;  %v1087_v28 = vld [vmem:[%s1305_s1 + $0x20] sm:$0xff] }
  0xdb   :  { %v715_v11 = vpop.eup %714  ;;  %v274_v42 = vadd.f32 1e-05, %v258_v55  ;;  %v244_v31 = vsub.f32 %v212_v17, %v228_v46  ;;  %v179_v40 = vpop.xlane.xlu1 %178  ;;  %v275_v61 = vadd.f32 1e-05, %v259_v34 }
  0xdc   :  { %v215_v41 = vmul.f32 0.00390625, %v179_v40  ;;  %v176_v39 = vpop.xlane.xlu0 %175  ;;  %v316_v25 = vmul.f32 %v715_v11, %v1070_v29  ;;  %v261_v47 = vmax.f32 %v245_v51, 0.0 }
  0xdd   :  { %724 = vrsqrt.f32 %v274_v42  ;;  %v260_v53 = vmax.f32 %v244_v31, 0.0  ;;  %v214_v62 = vmul.f32 0.00390625, %v176_v39  ;;  %v233_v39 = vmul.f32 %v1077_v54, %v1077_v54 }
  0xde   :  { %362 = vrot.lane.b32.xlu0 %v330_v38, %s794_s30  ;;  %438 = vperm.xlu1 %707, %v316_v25   ;;  %726 = vrsqrt.f32 %v273_v45  ;;  %v247_v43 = vsub.f32 %v215_v41, %v231_v59  ;;  %v331_v42 = vmul.f32 %v315_v22, %v997_v48  ;;  %v232_v38 = vmul.f32 %v1082_v24, %v1082_v24  ;;  %v1101_v59 = vld [vmem:[%s1305_s1 + $0x30] sm:$0xff] }
  0xdf   :  { %v717_v30 = vpop.eup %716  ;;  %v276_v50 = vadd.f32 1e-05, %v260_v53  ;;  %v246_v49 = vsub.f32 %v214_v62, %v230_v44  ;;  %v185_v46 = vpop.xlane.xlu1 %184  ;;  %v1106_v44 = vld [vmem:[%s1305_s1 + $0x18] sm:$0xff]  ;;  %v277_v48 = vadd.f32 1e-05, %v261_v47 }
  0xe0   :  { %v719_v55 = vpop.eup %718  ;;  %v217_v17 = vmul.f32 0.00390625, %v185_v46  ;;  %v182_v11 = vpop.xlane.xlu0 %181  ;;  %v1094_v34 = vmul.f32 %v717_v30, %v1087_v28  ;;  %v263_v40 = vmax.f32 %v247_v43, 0.0  ;;  %v332_v30 = vmul.f32 %v316_v25, %v1007_v56  ;;  %v1125_v43 = vld [vmem:[%s1305_s1 + $0x28] sm:$0xff] }
  0xe1   :  { %728 = vrsqrt.f32 %v276_v50  ;;  %v262_v51 = vmax.f32 %v246_v49, 0.0  ;;  %v216_v45 = vmul.f32 0.00390625, %v182_v11 }
  0xe2   :  { %730 = vrsqrt.f32 %v275_v61  ;;  %364 = vrot.lane.b32.xlu1 %v331_v42, %s794_s30  ;;  %v334_v22 = vmul.f32 %v1094_v34, %v1015_v3  ;;  %v249_v53 = vsub.f32 %v217_v17, %v233_v39  ;;  %v317_v61 = vmul.f32 %v719_v55, %v1106_v44  ;;  %v1120_v3 = vld [vmem:[%s1305_s1 + $0x40] sm:$0xff] }
  0xe3   :  { %v721_v31 = vpop.eup %720  ;;  %v278_v41 = vadd.f32 1e-05, %v262_v51  ;;  %v248_v62 = vsub.f32 %v216_v45, %v232_v38  ;;  %v279_v46 = vadd.f32 1e-05, %v263_v40  ;;  %v1137_v51 = vld [vmem:[%s1305_s1 + $0x50] sm:$0xff] }
  0xe4   :  { %370 = vrot.lane.b32.xlu0 %v334_v22, %s794_s30  ;;  %v1114_v50 = vmul.f32 %v721_v31, %v1101_v59  ;;  %v723_v47 = vpop.eup %722  ;;  %v265_v55 = vmax.f32 %v249_v53, 0.0  ;;  %v333_v17 = vmul.f32 %v317_v61, %v1003_v52  ;;  %v1153_v53 = vld [vmem:[%s1305_s1 + $0x60] sm:$0xff] }
  0xe5   :  { %732 = vrsqrt.f32 %v278_v41  ;;  %v264_v49 = vmax.f32 %v248_v62, 0.0  ;;  %v319_v42 = vmul.f32 %v723_v47, %v1125_v43 }
  0xe6   :  { %366 = vrot.lane.b32.xlu1 %v332_v30, %s794_s30  ;;  %v336_v25 = vmul.f32 %v1114_v50, %v1025_v37  ;;  %734 = vrsqrt.f32 %v277_v48  ;;  %v1142_v37 = vld [vmem:[%s1305_s1 + $0x38] sm:$0xff]  ;;  %v281_v48 = vadd.f32 1e-05, %v265_v55 }
  0xe7   :  { %v725_v56 = vpop.eup %724  ;;  %v280_v39 = vadd.f32 1e-05, %v264_v49  ;;  %v335_v31 = vmul.f32 %v319_v42, %v1011_v60 }
  0xe8   :  { %374 = vrot.lane.b32.xlu0 %v336_v25, %s794_s30  ;;  %v322_v11 = vmul.f32 %v725_v56, %v1120_v3  ;;  %v727_v38 = vpop.eup %726  ;;  %v1169_v56 = vld [vmem:[%s1305_s1 + $0x70] sm:$0xff] }
  0xe9   :  { %736 = vrsqrt.f32 %v280_v39  ;;  %v321_v41 = vmul.f32 %v727_v38, %v1142_v37 }
  0xea   :  { %368 = vrot.lane.b32.xlu1 %v333_v17, %s794_s30  ;;  %v338_v52 = vmul.f32 %v322_v11, %v1031_v23  ;;  %738 = vrsqrt.f32 %v279_v46  ;;  %v1158_v23 = vld [vmem:[%s1305_s1 + $0x48] sm:$0xff] }
  0xeb   :  { %v729_v45 = vpop.eup %728  ;;  %740 = vrsqrt.f32 %v281_v48  ;;  %v337_v60 = vmul.f32 %v321_v41, %v1023_v58 }
  0xec   :  { %v731_v22 = vpop.eup %730  ;;  %378 = vrot.lane.b32.xlu0 %v338_v52, %s794_s30  ;;  %v324_v40 = vmul.f32 %v729_v45, %v1137_v51  ;;  %v1185_v52 = vld [vmem:[%s1305_s1 + $0x68] sm:$0xff] }
  0xed   :  { %v323_v49 = vmul.f32 %v731_v22, %v1158_v23  ;;  %v1195_v22 = vld [vmem:[%s1305_s1 + $0x78] sm:$0xff] }
  0xee   :  { %372 = vrot.lane.b32.xlu1 %v335_v31, %s794_s30  ;;  %v340_v62 = vmul.f32 %v324_v40, %v1043_v7  ;;  %v1174_v7 = vld [vmem:[%s1305_s1 + $0x58] sm:$0xff]  ;;  %s796_s1 = smov [#allocation5]  }
  0xef   :  { %v733_v30 = vpop.eup %732  ;;  %v339_v55 = vmul.f32 %v323_v49, %v1027_v16  ;;  %s687_s28 = sshll.u32 %s796_s1, 4  ;;  %s688_s28 = int_to_ptr.vmem [resolvable:$true] %s687_s28 }
  0xf0   :  { %382 = vrot.lane.b32.xlu0 %v340_v62, %s794_s30  ;;  %v326_v47 = vmul.f32 %v733_v30, %v1153_v53  ;;  %v735_v25 = vpop.eup %734  ;;  %s764_s29 = scalar_lea.vmem %s688_s28, 4096  ;;  %p769_p9 = scmp.lt.s32.totalorder %s688_s28, %s688_s28 }
  0xf1   :  { %v325_v17 = vmul.f32 %v735_v25, %v1174_v7  ;;  %p765_p8 = scmp.ne.s32.totalorder %s688_s28, %s764_s29  ;;  %p770_p10 = scmp.lt.s32.totalorder %s764_s29, %s764_s29 }
  0xf2   :  { %376 = vrot.lane.b32.xlu1 %v337_v60, %s794_s30  ;;  %v342_v46 = vmul.f32 %v326_v47, %v1059_v57 }
  0xf3   :  { %v737_v58 = vpop.eup %736  ;;  %v341_v57 = vmul.f32 %v325_v17, %v1040_v10  ;;  %v795_v10 = vmov 1   ;;  %p771_p11 = por %p770_p10, %p769_p9 }
  0xf4   :  { %386 = vrot.lane.b32.xlu0 %v342_v46, %s794_s30  ;;  %v328_v39 = vmul.f32 %v737_v58, %v1169_v56  ;;  %v739_v38 = vpop.eup %738 }
  0xf5   :  { %v327_v16 = vmul.f32 %v739_v38, %v1185_v52  ;;  %v741_v48 = vpop.eup %740  ;;  %p772_p12 = pnand %p771_p11, %p765_p8 }
  0xf6   :  { %380 = vrot.lane.b32.xlu1 %v339_v55, %s794_s30  ;;  %v344_v45 = vmul.f32 %v328_v39, %v1082_v24  ;;  %v329_v62 = vmul.f32 %v741_v48, %v1195_v22 }
  0xf7   :  { %v343_v31 = vmul.f32 %v327_v16, %v1051_v36 }
  0xf8   :  { %390 = vrot.lane.b32.xlu0 %v344_v45, %s794_s30  ;;  %v345_v24 = vmul.f32 %v329_v62, %v1077_v54 }
  0xfa   :  { %384 = vrot.lane.b32.xlu1 %v341_v57, %s794_s30 }
  0xfc   :  { %443 = vperm.xlu0 %706, %v317_v61  }
  0xfe   :  { %388 = vrot.lane.b32.xlu1 %v343_v31, %s794_s30 }
 0x100   :  { %453 = vperm.xlu0 %706, %v319_v42  }
 0x102   :  { %392 = vrot.lane.b32.xlu1 %v345_v24, %s794_s30 }
 0x104   :  { %463 = vperm.xlu0 %706, %v321_v41  }
 0x106   :  { %448 = vperm.xlu1 %707, %v1094_v34  }
 0x108   :  { %473 = vperm.xlu0 %706, %v323_v49  }
 0x10a   :  { %458 = vperm.xlu1 %707, %v1114_v50  }
 0x10c   :  { %483 = vperm.xlu0 %706, %v325_v17  }
 0x10e   :  { %468 = vperm.xlu1 %707, %v322_v11  }
 0x110   :  { %493 = vperm.xlu0 %706, %v327_v16  }
 0x112   :  { %478 = vperm.xlu1 %707, %v324_v40  }
 0x114   :  { %503 = vperm.xlu0 %706, %v329_v62  }
 0x116   :  { %488 = vperm.xlu1 %707, %v326_v47  }
 0x118   :  { %709 = vset.pattern.permute.xlu0 %v795_v10 }
 0x11a   :  { %498 = vperm.xlu1 %707, %v328_v39  }
 0x11e   :  { %708 = vset.pattern.permute.xlu1 %v795_v10 }
 0x158   :  { %v1205_v36 = vpop.permute.xlu1 %433 }
 0x159   :  { %v1207_v54 = vpop.permute.xlu0 %428 }
 0x15d   :  { %v1209_v61 = vpop.permute.xlu1 %438  ;;  %v363_v34 = vpop.permute.xlu0 %362 }
 0x15e   :  { %v410_v42 = vsub.f32 %v1056_v35, %v363_v34 }
 0x160   :  { %540 = vperm.xlu1 %708, %v410_v42  }
 0x161   :  { %v365_v50 = vpop.permute.xlu1 %364  ;;  %v371_v11 = vpop.permute.xlu0 %370 }
 0x162   :  { %v411_v40 = vsub.f32 %v1048_v63, %v365_v50  ;;  %v414_v60 = vsub.f32 %v1087_v28, %v371_v11 }
 0x164   :  { %545 = vperm.xlu0 %709, %v411_v40   ;;  %v507_v40 = vmul.f32 %v1207_v54, %v835_v4  ;;  %v511_v4 = vmul.f32 %v1209_v61, %v829_v1 }
 0x165   :  { %v367_v41 = vpop.permute.xlu1 %366  ;;  %v375_v30 = vpop.permute.xlu0 %374 }
 0x166   :  { %v412_v47 = vsub.f32 %v1070_v29, %v367_v41  ;;  %v416_v46 = vsub.f32 %v1101_v59, %v375_v30 }
 0x168   :  { %550 = vperm.xlu1 %708, %v412_v47   ;;  %560 = vperm.xlu0 %709, %v414_v60  }
 0x169   :  { %v369_v49 = vpop.permute.xlu1 %368  ;;  %v379_v25 = vpop.permute.xlu0 %378 }
 0x16a   :  { %v413_v35 = vsub.f32 %v1106_v44, %v369_v49  ;;  %v418_v63 = vsub.f32 %v1120_v3, %v379_v25  ;;  %v508_v49 = vmul.f32 %v1205_v36, %v843_v8  ;;  %v509_v25 = vmul.f32 %v1205_v36, %v845_v9 }
 0x16c   :  { %555 = vperm.xlu1 %708, %v413_v35   ;;  %570 = vperm.xlu0 %709, %v416_v46  }
 0x16d   :  { %v373_v58 = vpop.permute.xlu1 %372  ;;  %v383_v55 = vpop.permute.xlu0 %382 }
 0x16e   :  { %v415_v39 = vsub.f32 %v1125_v43, %v373_v58  ;;  %v420_v17 = vsub.f32 %v1137_v51, %v383_v55 }
 0x170   :  { %565 = vperm.xlu1 %708, %v415_v39   ;;  %580 = vperm.xlu0 %709, %v418_v63  }
 0x171   :  { %v377_v28 = vpop.permute.xlu1 %376  ;;  %v387_v29 = vpop.permute.xlu0 %386 }
 0x172   :  { %v417_v38 = vsub.f32 %v1142_v37, %v377_v28  ;;  %v422_v44 = vsub.f32 %v1153_v53, %v387_v29 }
 0x174   :  { %575 = vperm.xlu1 %708, %v417_v38   ;;  %590 = vperm.xlu0 %709, %v420_v17  }
 0x175   :  { %v381_v59 = vpop.permute.xlu1 %380  ;;  %v391_v57 = vpop.permute.xlu0 %390 }
 0x176   :  { %v419_v45 = vsub.f32 %v1158_v23, %v381_v59  ;;  %v424_v43 = vsub.f32 %v1169_v56, %v391_v57 }
 0x178   :  { %585 = vperm.xlu1 %708, %v419_v45   ;;  %600 = vperm.xlu0 %709, %v422_v44  }
 0x179   :  { %v385_v3 = vpop.permute.xlu1 %384 }
 0x17a   :  { %v421_v16 = vsub.f32 %v1174_v7, %v385_v3 }
 0x17b   :  { %v444_v53 = vpop.permute.xlu0 %443 }
 0x17c   :  { %595 = vperm.xlu1 %708, %v421_v16   ;;  %610 = vperm.xlu0 %709, %v424_v43   ;;  %v512_v29 = vmul.f32 %v444_v53, %v837_v5  ;;  %v513_v17 = vmul.f32 %v444_v53, %v839_v6 }
 0x17d   :  { %v389_v51 = vpop.permute.xlu1 %388 }
 0x17e   :  { %v423_v37 = vsub.f32 %v1185_v52, %v389_v51 }
 0x17f   :  { %v454_v62 = vpop.permute.xlu0 %453 }
 0x180   :  { %605 = vperm.xlu1 %708, %v423_v37   ;;  %v516_v45 = vmul.f32 %v454_v62, %v851_v12  ;;  %v517_v5 = vmul.f32 %v454_v62, %v853_v13 }
 0x181   :  { %v393_v48 = vpop.permute.xlu1 %392 }
 0x182   :  { %v425_v31 = vsub.f32 %v1195_v22, %v393_v48  ;;  %v506_v22 = vmul.f32 %v1207_v54, %v831_v2  ;;  %v510_v2 = vmul.f32 %v1209_v61, %v827_v0 }
 0x183   :  { %v464_v10 = vpop.permute.xlu0 %463 }
 0x184   :  { %615 = vperm.xlu1 %708, %v425_v31   ;;  %v520_v37 = vmul.f32 %v464_v10, %v863_v18  ;;  %v521_v12 = vmul.f32 %v464_v10, %v865_v19  ;;  %v1332_v18 = vld [vmem:[#allocation9_spill] sm:$0xff]  ;;  %v1333_v10 = vld [vmem:[#allocation14_spill] sm:$0xff] }
 0x185   :  { %v449_v23 = vpop.permute.xlu1 %448 }
 0x186   :  { %v514_v54 = vmul.f32 %v449_v23, %v855_v14  ;;  %v515_v55 = vmul.f32 %v449_v23, %v857_v15 }
 0x187   :  { %v1227_v42 = vpop.permute.xlu0 %473 }
 0x188   :  { %v525_v19 = vmul.f32 %v1227_v42, %v1332_v18 }
 0x189   :  { %v459_v24 = vpop.permute.xlu1 %458 }
 0x18a   :  { %v518_v0 = vmul.f32 %v459_v24, %v867_v20  ;;  %v519_v1 = vmul.f32 %v459_v24, %v869_v21  ;;  %v1331_v24 = vld [vmem:[#allocation8_spill] sm:$0xff] }
 0x18b   :  { %v1229_v7 = vpop.permute.xlu0 %483 }
 0x18d   :  { %v469_v34 = vpop.permute.xlu1 %468 }
 0x18e   :  { %v522_v6 = vmul.f32 %v469_v34, %v879_v26  ;;  %v523_v20 = vmul.f32 %v469_v34, %v881_v27  ;;  %v524_v34 = vmul.f32 %v1227_v42, %v1331_v24  ;;  %v1336_v42 = vld [vmem:[#allocation11_spill] sm:$0xff] }
 0x18f   :  { %v1233_v11 = vpop.permute.xlu0 %493 }
 0x191   :  { %v479_v56 = vpop.permute.xlu1 %478 }
 0x192   :  { %v526_v13 = vmul.f32 %v479_v56, %v891_v32  ;;  %v527_v26 = vmul.f32 %v479_v56, %v893_v33  ;;  %v1334_v33 = vld [vmem:[#allocation15_spill] sm:$0xff] }
 0x193   :  { %v1241_v41 = vpop.permute.xlu0 %503 }
 0x195   :  { %v1231_v50 = vpop.permute.xlu1 %488 }
 0x196   :  { %v530_v32 = vmul.f32 %v1231_v50, %v1333_v10  ;;  %v531_v56 = vmul.f32 %v1231_v50, %v1334_v33  ;;  %v1338_v50 = vld [vmem:[#allocation19_spill] sm:$0xff] }
 0x199   :  { %v1235_v52 = vpop.permute.xlu1 %498 }
 0x1df   :  { %v541_v30 = vpop.permute.xlu1 %540 }
 0x1e0   :  { %v618_v60 = vadd.f32 %v541_v30, %v506_v22  ;;  %v619_v47 = vadd.f32 %v541_v30, %v507_v40 }
 0x1e2   :  { %650 = vst [vmem:[#allocation5] sm:$0xff] %v618_v60  ;;  %651 = vst [vmem:[#allocation5 + $0x8] sm:$0xff] %v619_v47 }
 0x1e3   :  { %v546_v46 = vpop.permute.xlu0 %545 }
 0x1e4   :  { %v620_v35 = vadd.f32 %v546_v46, %v508_v49  ;;  %v621_v58 = vadd.f32 %v546_v46, %v509_v25  ;;  %v1335_v25 = vld [vmem:[#allocation10_spill] sm:$0xff] }
 0x1e5   :  { %v528_v46 = vmul.f32 %v1229_v7, %v1335_v25 }
 0x1e6   :  { %652 = vst [vmem:[#allocation5 + $0x10] sm:$0xff] %v620_v35  ;;  %653 = vst [vmem:[#allocation5 + $0x18] sm:$0xff] %v621_v58  ;;  %v529_v35 = vmul.f32 %v1229_v7, %v1336_v42  ;;  %v1337_v58 = vld [vmem:[#allocation18_spill] sm:$0xff]  ;;  %v1340_v7 = vld [vmem:[#allocation13_spill] sm:$0xff] }
 0x1e7   :  { %v551_v8 = vpop.permute.xlu1 %550  ;;  %v561_v63 = vpop.permute.xlu0 %560 }
 0x1e8   :  { %v622_v9 = vadd.f32 %v551_v8, %v510_v2  ;;  %v623_v36 = vadd.f32 %v551_v8, %v511_v4  ;;  %v626_v39 = vadd.f32 %v561_v63, %v514_v54  ;;  %v627_v28 = vadd.f32 %v561_v63, %v515_v55 }
 0x1e9   :  { %v534_v2 = vmul.f32 %v1235_v52, %v1337_v58  ;;  %v535_v4 = vmul.f32 %v1235_v52, %v1338_v50 }
 0x1ea   :  { %654 = vst [vmem:[#allocation5 + $0x20] sm:$0xff] %v622_v9  ;;  %655 = vst [vmem:[#allocation5 + $0x28] sm:$0xff] %v623_v36 }
 0x1eb   :  { %658 = vst [vmem:[#allocation5 + $0x40] sm:$0xff] %v626_v39  ;;  %659 = vst [vmem:[#allocation5 + $0x48] sm:$0xff] %v627_v28  ;;  %v556_v14 = vpop.permute.xlu1 %555  ;;  %v571_v15 = vpop.permute.xlu0 %570  ;;  %v1339_v39 = vld [vmem:[#allocation12_spill] sm:$0xff] }
 0x1ec   :  { %v624_v61 = vadd.f32 %v556_v14, %v512_v29  ;;  %v625_v38 = vadd.f32 %v556_v14, %v513_v17  ;;  %v630_v59 = vadd.f32 %v571_v15, %v518_v0  ;;  %v631_v44 = vadd.f32 %v571_v15, %v519_v1  ;;  %v1341_v1 = vld [vmem:[#allocation16_spill] sm:$0xff]  ;;  %v1342_v15 = vld [vmem:[#allocation17_spill] sm:$0xff] }
 0x1ed   :  { %v532_v28 = vmul.f32 %v1233_v11, %v1339_v39  ;;  %v533_v29 = vmul.f32 %v1233_v11, %v1340_v7  ;;  %v536_v14 = vmul.f32 %v1241_v41, %v1341_v1 }
 0x1ee   :  { %656 = vst [vmem:[#allocation5 + $0x30] sm:$0xff] %v624_v61  ;;  %657 = vst [vmem:[#allocation5 + $0x38] sm:$0xff] %v625_v38  ;;  %v537_v61 = vmul.f32 %v1241_v41, %v1342_v15 }
 0x1ef   :  { %662 = vst [vmem:[#allocation5 + $0x60] sm:$0xff] %v630_v59  ;;  %663 = vst [vmem:[#allocation5 + $0x68] sm:$0xff] %v631_v44  ;;  %v566_v21 = vpop.permute.xlu1 %565  ;;  %v581_v57 = vpop.permute.xlu0 %580 }
 0x1f0   :  { %v628_v3 = vadd.f32 %v566_v21, %v516_v45  ;;  %v629_v43 = vadd.f32 %v566_v21, %v517_v5  ;;  %v634_v16 = vadd.f32 %v581_v57, %v522_v6  ;;  %v635_v51 = vadd.f32 %v581_v57, %v523_v20 }
 0x1f2   :  { %660 = vst [vmem:[#allocation5 + $0x50] sm:$0xff] %v628_v3  ;;  %661 = vst [vmem:[#allocation5 + $0x58] sm:$0xff] %v629_v43 }
 0x1f3   :  { %666 = vst [vmem:[#allocation5 + $0x80] sm:$0xff] %v634_v16  ;;  %667 = vst [vmem:[#allocation5 + $0x88] sm:$0xff] %v635_v51  ;;  %v576_v27 = vpop.permute.xlu1 %575  ;;  %v591_v48 = vpop.permute.xlu0 %590 }
 0x1f4   :  { %v632_v31 = vadd.f32 %v576_v27, %v520_v37  ;;  %v633_v53 = vadd.f32 %v576_v27, %v521_v12  ;;  %v638_v23 = vadd.f32 %v591_v48, %v526_v13  ;;  %v639_v62 = vadd.f32 %v591_v48, %v527_v26 }
 0x1f6   :  { %664 = vst [vmem:[#allocation5 + $0x70] sm:$0xff] %v632_v31  ;;  %665 = vst [vmem:[#allocation5 + $0x78] sm:$0xff] %v633_v53 }
 0x1f7   :  { %670 = vst [vmem:[#allocation5 + $0xa0] sm:$0xff] %v638_v23  ;;  %671 = vst [vmem:[#allocation5 + $0xa8] sm:$0xff] %v639_v62  ;;  %v586_v22 = vpop.permute.xlu1 %585  ;;  %v601_v40 = vpop.permute.xlu0 %600 }
 0x1f8   :  { %v636_v30 = vadd.f32 %v586_v22, %v524_v34  ;;  %v637_v60 = vadd.f32 %v586_v22, %v525_v19  ;;  %v642_v47 = vadd.f32 %v601_v40, %v530_v32  ;;  %v643_v49 = vadd.f32 %v601_v40, %v531_v56 }
 0x1fa   :  { %668 = vst [vmem:[#allocation5 + $0x90] sm:$0xff] %v636_v30  ;;  %669 = vst [vmem:[#allocation5 + $0x98] sm:$0xff] %v637_v60 }
 0x1fb   :  { %674 = vst [vmem:[#allocation5 + $0xc0] sm:$0xff] %v642_v47  ;;  %675 = vst [vmem:[#allocation5 + $0xc8] sm:$0xff] %v643_v49  ;;  %v596_v54 = vpop.permute.xlu1 %595  ;;  %v611_v55 = vpop.permute.xlu0 %610 }
 0x1fc   :  { %v640_v8 = vadd.f32 %v596_v54, %v528_v46  ;;  %v641_v63 = vadd.f32 %v596_v54, %v529_v35  ;;  %v646_v9 = vadd.f32 %v611_v55, %v534_v2  ;;  %v647_v36 = vadd.f32 %v611_v55, %v535_v4 }
 0x1fe   :  { %672 = vst [vmem:[#allocation5 + $0xb0] sm:$0xff] %v640_v8  ;;  %673 = vst [vmem:[#allocation5 + $0xb8] sm:$0xff] %v641_v63 }
 0x1ff   :  { %678 = vst [vmem:[#allocation5 + $0xe0] sm:$0xff] %v646_v9  ;;  %679 = vst [vmem:[#allocation5 + $0xe8] sm:$0xff] %v647_v36  ;;  %v606_v52 = vpop.permute.xlu1 %605 }
 0x200   :  { %v644_v17 = vadd.f32 %v606_v52, %v532_v28  ;;  %v645_v0 = vadd.f32 %v606_v52, %v533_v29 }
 0x202   :  { %676 = vst [vmem:[#allocation5 + $0xd0] sm:$0xff] %v644_v17  ;;  %677 = vst [vmem:[#allocation5 + $0xd8] sm:$0xff] %v645_v0 }
 0x203   :  { %v616_v38 = vpop.permute.xlu1 %615 }
 0x204   :  { %v648_v59 = vadd.f32 %v616_v38, %v536_v14  ;;  %v649_v11 = vadd.f32 %v616_v38, %v537_v61 }
 0x206   :  { %680 = vst [vmem:[#allocation5 + $0xf0] sm:$0xff] %v648_v59  ;;  %681 = vst [vmem:[#allocation5 + $0xf8] sm:$0xff] %v649_v11 }
 0x207   :  { %775 = shalt.err (!%p772_p12)
}
 0x208   :  { %s776_s4 = scalar_lea.hbm %s1306_s2, 4096 }
 0x209   :  { %p777_p13 = scmp.ne.s32.totalorder %s1306_s2, %s776_s4  ;;  %p780_p0 = scmp.lt.u32.totalorder %s776_s4, %s1306_s2 }
 0x20b   :  { %p782_p1 = pnand %p780_p0, %p777_p13 }
 0x20d   :  { %785 = shalt.err (!%p782_p1)
}
 0x20e   :  { %693 = dma.vmem_to_hbm [thread:$0]  %s688_s28, 4096, %s1306_s2, [#allocation4], %s791_s19, %s791_s19, %s792_s20  }
 0x20f   :  { %788 = dma.done.wait [#allocation4], 4096  }
 0x210   :  { %789 = vsyncadd [#allocation4], 4294963200 }
 0x211   :  { %697 = vsyncpa [#allocation3], 1 }
 0x212   :  { %698 = vsyncpa [#allocation4], 1 }

</bundles_post_ra>
